<compile_context>
chip_gen: v6e
topology: v6e:2x2x1
jax: 0.10.0
libtpu: 0.0.40
codegen_flags: <defaults>
</compile_context>

<pallas_src>
import functools

import jax
import jax.numpy as jnp
from jax.experimental import pallas as pl
from jax.experimental.pallas import tpu as pltpu


# ----------------------------- Pallas kernel --------------------------------
def _disc_fwd_kernel(obs_t_ref,   # [obs_dim, TB]  bf16
                     act_t_ref,   # [act_dim, TB]  bf16
                     ws_t_ref,    # [R, obs_dim]   bf16  (fc_s weight, transposed)
                     wa_t_ref,    # [R, act_dim]   bf16  (fc_a weight, transposed)
                     w1_t_ref,    # [H, 2R]        bf16  (head hidden 1, transposed)
                     w2_t_ref,    # [H, H]         bf16  (head hidden 2, transposed)
                     fp_ref,      # [2R + 3H + 1, 1] f32: [bs|ba | b1 | b2 | w3 | b3]
                     out_ref,     # [1, TB]        f32  (lane-dense logits row)
                     *, repr_dim, hidden):
    f32, bf16 = jnp.float32, jnp.bfloat16
    r2, h = 2 * repr_dim, hidden

    # Packed small f32 params (static sublane slices of one column operand).
    b_sa = fp_ref[0:r2, :]                           # [2R, 1]
    b1   = fp_ref[r2:r2 + h, :]                      # [H, 1]
    b2   = fp_ref[r2 + h:r2 + 2 * h, :]              # [H, 1]
    w3   = fp_ref[r2 + 2 * h:r2 + 3 * h, :]          # [H, 1]
    b3   = fp_ref[r2 + 3 * h:r2 + 3 * h + 1, :]      # [1, 1]

    # fc_s / fc_a: feature-major matmuls, batch tile on the MXU N / lane axis.
    s_pre = jnp.dot(ws_t_ref[...], obs_t_ref[...], preferred_element_type=f32)  # [R, TB]
    a_pre = jnp.dot(wa_t_ref[...], act_t_ref[...], preferred_element_type=f32)  # [R, TB]

    # concat([s_repr, a_repr], -1) == sublane-axis concat in feature-major layout
    # (R is a multiple of 8, so this is an aligned VMEM copy).
    x = jnp.concatenate([s_pre, a_pre], axis=0)                                 # [2R, TB]
    x = jnp.maximum(x + b_sa, 0.0)                                              # f32 relu

    # Head hidden layers (bf16 MXU inputs, f32 accumulate / bias / relu).
    x = jnp.dot(w1_t_ref[...], x.astype(bf16), preferred_element_type=f32) + b1
    x = jnp.maximum(x, 0.0)                                                     # [H, TB]
    x = jnp.dot(w2_t_ref[...], x.astype(bf16), preferred_element_type=f32) + b2
    x = jnp.maximum(x, 0.0)                                                     # [H, TB]

    # Head output layer (N=1): VPU multiply + sublane reduce -> lane-dense [1, TB].
    out_ref[...] = (jnp.sum(x * w3, axis=0, keepdims=True) + b3).astype(out_ref.dtype)


# ------------------------------- wrapper -------------------------------------
def _round_up(n, m):
    return ((n + m - 1) // m) * m


def _choose_batch_tile(batch, block_b):
    """Lane-aligned batch tile; >= 2 tiles once the batch is big enough (v7x 2 TCs)."""
    if batch <= 256:
        return batch                      # single full-extent tile (tiny problem)
    block_b = max(128, (block_b // 128) * 128)
    return min(block_b, _round_up(-(-batch // 2), 128))


def smodice_discriminator_forward(obs, action, params, block_b=1024):
    """obs: [B, obs_dim] f32, action: [B, act_dim] f32 -> logits [B, 1] f32."""
    B = obs.shape[0]

    # bf16 cast (needed for the MXU anyway) fused with the transpose to the
    # feature-major layout the kernel wants; no concat, no pad passes.
    obs_t = obs.astype(jnp.bfloat16).T       # [obs_dim, B]
    act_t = action.astype(jnp.bfloat16).T    # [act_dim, B]

    ws_t, wa_t = params["ws_t"], params["wa_t"]
    w1_t, w2_t = params["w1_t"], params["w2_t"]
    fp = params["fparams"]
    repr_dim, obs_dim = ws_t.shape
    act_dim = wa_t.shape[1]
    hidden = w1_t.shape[0]

    tb = _choose_batch_tile(B, block_b)
    grid = (pl.cdiv(B, tb),)

    kernel = functools.partial(_disc_fwd_kernel, repr_dim=repr_dim, hidden=hidden)

    batch_tile = lambda i: (0, i)    # batch-tiled operands (batch on the lane axis)
    replicated = lambda i: (0, 0)    # resident weights / packed params

    out = pl.pallas_call(
        kernel,
        out_shape=jax.ShapeDtypeStruct((1, B), jnp.float32),
        grid=grid,
        in_specs=[
            pl.BlockSpec((obs_dim, tb), batch_tile),
            pl.BlockSpec((act_dim, tb), batch_tile),
            pl.BlockSpec(ws_t.shape, replicated),
            pl.BlockSpec(wa_t.shape, replicated),
            pl.BlockSpec(w1_t.shape, replicated),
            pl.BlockSpec(w2_t.shape, replicated),
            pl.BlockSpec(fp.shape, replicated),
        ],
        out_specs=pl.BlockSpec((1, tb), batch_tile),
        compiler_params=pltpu.CompilerParams(
            dimension_semantics=("parallel",),        # batch tiles across v7x's 2 TCs
            vmem_limit_bytes=16 * 1024 * 1024,        # headroom for tb up to a few K
        ),
    )(obs_t, act_t, ws_t, wa_t, w1_t, w2_t, fp)

    return out.reshape(B, 1)   # [1, B] row-major == [B, 1]; ragged tail already masked


# -------------------------- parameter construction ---------------------------
def init_params(key, obs_dim, act_dim, repr_dim, hidden):
    """torch.nn.Linear-style init (U[-1/sqrt(fan_in), +1/sqrt(fan_in)])."""
    def linear(k, fan_in, fan_out):
        kw, kb = jax.random.split(k)
        bound = 1.0 / float(fan_in) ** 0.5
        w = jax.random.uniform(kw, (fan_in, fan_out), jnp.float32, -bound, bound)
        b = jax.random.uniform(kb, (fan_out,), jnp.float32, -bound, bound)
        return w, b

    ks = jax.random.split(key, 5)
    ws, bs = linear(ks[0], obs_dim, repr_dim)        # fc_s
    wa, ba = linear(ks[1], act_dim, repr_dim)        # fc_a
    w1, b1 = linear(ks[2], 2 * repr_dim, hidden)     # head hidden 1
    w2, b2 = linear(ks[3], hidden, hidden)           # head hidden 2
    w3, b3 = linear(ks[4], hidden, 1)                # head output

    # Packed f32 small-parameter column: [bs | ba | b1 | b2 | w3 | b3]
    fparams = jnp.concatenate([bs, ba, b1, b2, w3.reshape(-1), b3]).reshape(-1, 1)

    return {
        # kernel params (feature-major bf16 weights + packed f32 column)
        "ws_t": ws.T.astype(jnp.bfloat16), "wa_t": wa.T.astype(jnp.bfloat16),
        "w1_t": w1.T.astype(jnp.bfloat16), "w2_t": w2.T.astype(jnp.bfloat16),
        "fparams": fparams,
        # raw f32 params (reference only)
        "ws": ws, "bs": bs, "wa": wa, "ba": ba,
        "w1": w1, "b1": b1, "w2": w2, "b2": b2, "w3": w3, "b3": b3,
    }


# ------------------------------- references ----------------------------------
def reference_forward(obs, action, p):
    """Plain-JAX f32 reference matching the original module structure."""
    relu = lambda v: jnp.maximum(v, 0.0)
    s = relu(obs @ p["ws"] + p["bs"])
    a = relu(action @ p["wa"] + p["ba"])
    h = jnp.concatenate([s, a], axis=-1)
    h = relu(h @ p["w1"] + p["b1"])
    h = relu(h @ p["w2"] + p["b2"])
    return h @ p["w3"] + p["b3"]


def reference_forward_bf16(obs, action, p):
    """Precision-matched reference (bf16 MXU inputs, f32 accumulation) for tight checks."""
    bf16, f32 = jnp.bfloat16, jnp.float32
    dot = lambda a, b: jnp.dot(a.astype(bf16), b.astype(bf16), preferred_element_type=f32)
    relu = lambda v: jnp.maximum(v, 0.0)
    s = relu(dot(obs, p["ws"]) + p["bs"])
    a = relu(dot(action, p["wa"]) + p["ba"])
    h = jnp.concatenate([s, a], axis=-1)
    h = relu(dot(h, p["w1"]) + p["b1"])
    h = relu(dot(h, p["w2"]) + p["b2"])
    return h @ p["w3"] + p["b3"]


# ---------------------------------- main --------------------------------------
if __name__ == "__main__":
    OBS_DIM, ACT_DIM, REPR_DIM, HIDDEN = 16, 8, 32, 64

    key = jax.random.PRNGKey(0)
    k_obs, k_act, k_par, k_obs2, k_act2 = jax.random.split(key, 5)
    params = init_params(k_par, OBS_DIM, ACT_DIM, REPR_DIM, HIDDEN)

    # Small single-tile case.
    B1 = 8
    obs1 = jax.random.normal(k_obs, (B1, OBS_DIM), jnp.float32)
    act1 = jax.random.normal(k_act, (B1, ACT_DIM), jnp.float32)
    out1 = smodice_discriminator_forward(obs1, act1, params)
    jax.block_until_ready(out1)
    assert out1.shape == (B1, 1), out1.shape
    assert jnp.allclose(out1, reference_forward_bf16(obs1, act1, params),
                        atol=2e-3, rtol=2e-3), "mismatch vs bf16-matched reference"
    assert jnp.allclose(out1, reference_forward(obs1, act1, params),
                        atol=5e-2, rtol=5e-2), "mismatch vs f32 reference"

    # Multi-tile case with a ragged tail (grid=2: both v7x TensorCores get a tile).
    B2 = 333
    obs2 = jax.random.normal(k_obs2, (B2, OBS_DIM), jnp.float32)
    act2 = jax.random.normal(k_act2, (B2, ACT_DIM), jnp.float32)
    out2 = smodice_discriminator_forward(obs2, act2, params)
    jax.block_until_ready(out2)
    assert out2.shape == (B2, 1), out2.shape
    assert jnp.allclose(out2, reference_forward_bf16(obs2, act2, params),
                        atol=2e-3, rtol=2e-3), "mismatch vs bf16-matched reference (tiled)"

    # TODO(synk): compute_grad_pen / loss / predict_reward need autograd + BCE on top
    # of the kernel (jax.grad through pallas_call); only the forward hot path is fused.
    print("KERNEL_OK")
</pallas_src>

<mosaic_0001>
module attributes {stable_mosaic.version = 11 : i64} {
  func.func @_disc_fwd_kernel(%arg0: i32, %arg1: memref<16x8xbf16, #tpu.memory_space<vmem>>, %arg2: memref<8x8xbf16, #tpu.memory_space<vmem>>, %arg3: memref<32x16xbf16, #tpu.memory_space<vmem>>, %arg4: memref<32x8xbf16, #tpu.memory_space<vmem>>, %arg5: memref<64x64xbf16, #tpu.memory_space<vmem>>, %arg6: memref<64x64xbf16, #tpu.memory_space<vmem>>, %arg7: memref<257x1xf32, #tpu.memory_space<vmem>>, %arg8: memref<1x8xf32, #tpu.memory_space<vmem>>) attributes {dimension_semantics = [#tpu.dimension_semantics<parallel>], iteration_bounds = array<i64: 1>, scalar_prefetch = 0 : i64, scratch_operands = 0 : i64, tpu.core_type = #tpu.core_type<tc>, window_params = [{transform_indices = @transform_0, window_bounds = array<i64: 16, 8>}, {transform_indices = @transform_1, window_bounds = array<i64: 8, 8>}, {pipeline_mode = #tpu.pipeline_mode<synchronous>, transform_indices = @transform_2, window_bounds = array<i64: 32, 16>}, {pipeline_mode = #tpu.pipeline_mode<synchronous>, transform_indices = @transform_3, window_bounds = array<i64: 32, 8>}, {pipeline_mode = #tpu.pipeline_mode<synchronous>, transform_indices = @transform_4, window_bounds = array<i64: 64, 64>}, {pipeline_mode = #tpu.pipeline_mode<synchronous>, transform_indices = @transform_5, window_bounds = array<i64: 64, 64>}, {pipeline_mode = #tpu.pipeline_mode<synchronous>, transform_indices = @transform_6, window_bounds = array<i64: 257, 1>}, {transform_indices = @transform_7, window_bounds = array<i64: 1, 8>}]} {
    %c0 = arith.constant 0 : index
    %c0_0 = arith.constant 0 : index
    %0 = vector.load %arg7[%c0, %c0_0] : memref<257x1xf32, #tpu.memory_space<vmem>>, vector<64x1xf32>
    %c64 = arith.constant 64 : index
    %c0_1 = arith.constant 0 : index
    %1 = vector.load %arg7[%c64, %c0_1] : memref<257x1xf32, #tpu.memory_space<vmem>>, vector<64x1xf32>
    %c128 = arith.constant 128 : index
    %c0_2 = arith.constant 0 : index
    %2 = vector.load %arg7[%c128, %c0_2] : memref<257x1xf32, #tpu.memory_space<vmem>>, vector<64x1xf32>
    %c192 = arith.constant 192 : index
    %c0_3 = arith.constant 0 : index
    %3 = vector.load %arg7[%c192, %c0_3] : memref<257x1xf32, #tpu.memory_space<vmem>>, vector<64x1xf32>
    %c256 = arith.constant 256 : index
    %c0_4 = arith.constant 0 : index
    %4 = vector.load %arg7[%c256, %c0_4] : memref<257x1xf32, #tpu.memory_space<vmem>>, vector<1x1xf32>
    %c0_5 = arith.constant 0 : index
    %c0_6 = arith.constant 0 : index
    %5 = vector.load %arg3[%c0_5, %c0_6] : memref<32x16xbf16, #tpu.memory_space<vmem>>, vector<32x16xbf16>
    %c0_7 = arith.constant 0 : index
    %c0_8 = arith.constant 0 : index
    %6 = vector.load %arg1[%c0_7, %c0_8] : memref<16x8xbf16, #tpu.memory_space<vmem>>, vector<16x8xbf16>
    %cst = arith.constant dense<0.000000e+00> : vector<32x8xf32>
    %7 = tpu.matmul %5, %6, %cst {dimension_numbers = #tpu.dot_dimension_numbers<[1], [0], [0], [1], [0, 0, 1, 1], [], []>} : vector<32x16xbf16>, vector<16x8xbf16>, vector<32x8xf32> -> vector<32x8xf32>
    %c0_9 = arith.constant 0 : index
    %c0_10 = arith.constant 0 : index
    %8 = vector.load %arg4[%c0_9, %c0_10] : memref<32x8xbf16, #tpu.memory_space<vmem>>, vector<32x8xbf16>
    %c0_11 = arith.constant 0 : index
    %c0_12 = arith.constant 0 : index
    %9 = vector.load %arg2[%c0_11, %c0_12] : memref<8x8xbf16, #tpu.memory_space<vmem>>, vector<8x8xbf16>
    %cst_13 = arith.constant dense<0.000000e+00> : vector<32x8xf32>
    %10 = tpu.matmul %8, %9, %cst_13 {dimension_numbers = #tpu.dot_dimension_numbers<[1], [0], [0], [1], [0, 0, 1, 1], [], []>} : vector<32x8xbf16>, vector<8x8xbf16>, vector<32x8xf32> -> vector<32x8xf32>
    %11 = tpu.concatenate %7, %10 in 0 : vector<32x8xf32>, vector<32x8xf32> -> vector<64x8xf32>
    %12 = vector.broadcast %0 : vector<64x1xf32> to vector<64x8xf32>
    %13 = arith.addf %11, %12 : vector<64x8xf32>
    %cst_14 = arith.constant 0.000000e+00 : f32
    %14 = vector.broadcast %cst_14 : f32 to vector<64x8xf32>
    %15 = arith.maximumf %13, %14 : vector<64x8xf32>
    %c0_15 = arith.constant 0 : index
    %c0_16 = arith.constant 0 : index
    %16 = vector.load %arg5[%c0_15, %c0_16] : memref<64x64xbf16, #tpu.memory_space<vmem>>, vector<64x64xbf16>
    %17 = arith.truncf %15 : vector<64x8xf32> to vector<64x8xbf16>
    %cst_17 = arith.constant dense<0.000000e+00> : vector<64x8xf32>
    %18 = tpu.matmul %16, %17, %cst_17 {dimension_numbers = #tpu.dot_dimension_numbers<[1], [0], [0], [1], [0, 0, 1, 1], [], []>} : vector<64x64xbf16>, vector<64x8xbf16>, vector<64x8xf32> -> vector<64x8xf32>
    %19 = vector.broadcast %1 : vector<64x1xf32> to vector<64x8xf32>
    %20 = arith.addf %18, %19 : vector<64x8xf32>
    %cst_18 = arith.constant 0.000000e+00 : f32
    %21 = vector.broadcast %cst_18 : f32 to vector<64x8xf32>
    %22 = arith.maximumf %20, %21 : vector<64x8xf32>
    %c0_19 = arith.constant 0 : index
    %c0_20 = arith.constant 0 : index
    %23 = vector.load %arg6[%c0_19, %c0_20] : memref<64x64xbf16, #tpu.memory_space<vmem>>, vector<64x64xbf16>
    %24 = arith.truncf %22 : vector<64x8xf32> to vector<64x8xbf16>
    %cst_21 = arith.constant dense<0.000000e+00> : vector<64x8xf32>
    %25 = tpu.matmul %23, %24, %cst_21 {dimension_numbers = #tpu.dot_dimension_numbers<[1], [0], [0], [1], [0, 0, 1, 1], [], []>} : vector<64x64xbf16>, vector<64x8xbf16>, vector<64x8xf32> -> vector<64x8xf32>
    %26 = vector.broadcast %2 : vector<64x1xf32> to vector<64x8xf32>
    %27 = arith.addf %25, %26 : vector<64x8xf32>
    %cst_22 = arith.constant 0.000000e+00 : f32
    %28 = vector.broadcast %cst_22 : f32 to vector<64x8xf32>
    %29 = arith.maximumf %27, %28 : vector<64x8xf32>
    %30 = vector.broadcast %3 : vector<64x1xf32> to vector<64x8xf32>
    %31 = arith.mulf %29, %30 : vector<64x8xf32>
    %cst_23 = arith.constant dense<0.000000e+00> : vector<8xf32>
    %32 = vector.multi_reduction <add>, %31, %cst_23 [0] : vector<64x8xf32> to vector<8xf32>
    %33 = vector.shape_cast %32 : vector<8xf32> to vector<1x8xf32>
    %34 = vector.broadcast %4 : vector<1x1xf32> to vector<1x8xf32>
    %35 = arith.addf %33, %34 : vector<1x8xf32>
    %c0_24 = arith.constant 0 : index
    %c0_25 = arith.constant 0 : index
    %36 = vector.load %arg8[%c0_24, %c0_25] : memref<1x8xf32, #tpu.memory_space<vmem>>, vector<1x8xf32>
    tpu.vector_store %arg8[%c0_24, %c0_25], %35 {strides = array<i32>} : memref<1x8xf32, #tpu.memory_space<vmem>>, vector<1x8xf32>,
    return
  }
  func.func @transform_0(%arg0: i32) -> (i32, i32) {
    %c0_i32 = arith.constant 0 : i32
    %c0_i32_0 = arith.constant 0 : i32
    return %c0_i32, %arg0 : i32, i32
  }
  func.func @transform_1(%arg0: i32) -> (i32, i32) {
    %c0_i32 = arith.constant 0 : i32
    %c0_i32_0 = arith.constant 0 : i32
    return %c0_i32, %arg0 : i32, i32
  }
  func.func @transform_2(%arg0: i32) -> (i32, i32) {
    %c0_i32 = arith.constant 0 : i32
    %c0_i32_0 = arith.constant 0 : i32
    %c0_i32_1 = arith.constant 0 : i32
    return %c0_i32, %c0_i32_0 : i32, i32
  }
  func.func @transform_3(%arg0: i32) -> (i32, i32) {
    %c0_i32 = arith.constant 0 : i32
    %c0_i32_0 = arith.constant 0 : i32
    %c0_i32_1 = arith.constant 0 : i32
    return %c0_i32, %c0_i32_0 : i32, i32
  }
  func.func @transform_4(%arg0: i32) -> (i32, i32) {
    %c0_i32 = arith.constant 0 : i32
    %c0_i32_0 = arith.constant 0 : i32
    %c0_i32_1 = arith.constant 0 : i32
    return %c0_i32, %c0_i32_0 : i32, i32
  }
  func.func @transform_5(%arg0: i32) -> (i32, i32) {
    %c0_i32 = arith.constant 0 : i32
    %c0_i32_0 = arith.constant 0 : i32
    %c0_i32_1 = arith.constant 0 : i32
    return %c0_i32, %c0_i32_0 : i32, i32
  }
  func.func @transform_6(%arg0: i32) -> (i32, i32) {
    %c0_i32 = arith.constant 0 : i32
    %c0_i32_0 = arith.constant 0 : i32
    %c0_i32_1 = arith.constant 0 : i32
    return %c0_i32, %c0_i32_0 : i32, i32
  }
  func.func @transform_7(%arg0: i32) -> (i32, i32) {
    %c0_i32 = arith.constant 0 : i32
    %c0_i32_0 = arith.constant 0 : i32
    return %c0_i32, %arg0 : i32, i32
  }
}

</mosaic_0001>

<bundles_post_ra>
// kernel: tpu_custom_call.1
= control target key start
LH: loop header
LB: loop body
LE: loop exit
PB: predicated region body
PF: predicated region fallthrough
CT: control target
= control target key end

     0   :  { %vm161_vm0 = vcmask 1043456   ;;  %vm154_vm1 = vcmask 64512   ;;  %vm83_vm2 = vcmask 130048   ;;  %v807_v8 = vmov 0   ;;  %s1011_s0 = inlined_call_operand.vmem [shape: bf16[16,8], index: 0, kind: input, shape index: {}]   ;;  %s1012_s1 = inlined_call_operand.vmem [shape: bf16[8,8], index: 1, kind: input, shape index: {}]   ;;  %s1013_s2 = inlined_call_operand.vmem [shape: bf16[32,16], index: 2, kind: input, shape index: {}]   ;;  %s1014_s3 = inlined_call_operand.vmem [shape: bf16[32,8], index: 3, kind: input, shape index: {}]   ;;  %s1015_s4 = inlined_call_operand.vmem [shape: bf16[64,64], index: 4, kind: input, shape index: {}]   ;;  %s1016_s5 = inlined_call_operand.vmem [shape: bf16[64,64], index: 5, kind: input, shape index: {}]   ;;  %s1017_s6 = inlined_call_operand.vmem [shape: f32[257,1], index: 6, kind: input, shape index: {}]   ;;  %s1018_s7 = inlined_call_operand.hbm [shape: f32[1,8], index: 7, kind: output, shape index: {}]  }
   0x1   :  { %v143_v0 = vld [vmem:[%s1012_s1] sm:$0xf]  ;;  %v774_v4 = vld [vmem:[%s1014_s3 + $0x8] sm:$0xff]   ;;  %v34_v7 = vld [vmem:[%s1017_s6 + $0x30] sm:$0xff]  ;;  %770 = vset.pattern.permute.xlu0 %v807_v8  ;;  %771 = vset.pattern.permute.xlu1 %v807_v8 }
   0x2   :  { %v772_v1 = vld [vmem:[%s1011_s0] sm:$0xff]   ;;  %767 = vmatprep.subr.msk.bf16.mxu1 %vm161_vm0, %v143_v0  ;;  %v163_v2 = vsel %vm161_vm0, %v143_v0, 0  ;;  %v776_v6 = vld [vmem:[%s1013_s2 + $0x8] sm:$0xff]   ;;  %246 = vperm.xlu0 %770, %v34_v7   ;;  %v35_v10 = vld [vmem:[%s1017_s6 + $0x38] sm:$0xff] }
   0x3   :  { %v773_v3 = vld [vmem:[%s1014_s3] sm:$0xff]   ;;  %730 = vmatpush3.bf16.msra.mxu1 %v163_v2  ;;  %723 = vmatprep.subr.bf16.mxu0 %v772_v1  ;;  %v33_v11 = vld [vmem:[%s1017_s6 + $0x28] sm:$0xff]  ;;  %v30_v12 = vld [vmem:[%s1017_s6 + $0x10] sm:$0xff] }
   0x4   :  { %724 = vmatpush3.bf16.msra.mxu0 %v772_v1  ;;  %731 = vmatprep.mubr.msk.bf16.mxu1 %vm154_vm1, %v773_v3  ;;  %v775_v5 = vld [vmem:[%s1013_s2] sm:$0xff]   ;;  %v31_v13 = vld [vmem:[%s1017_s6 + $0x18] sm:$0xff]  ;;  %v29_v15 = vld [vmem:[%s1017_s6 + $0x8] sm:$0xff] }
   0x5   :  { %725 = vmatprep.mubr.msk.bf16.mxu0 %vm83_vm2, %v775_v5  ;;  %v32_v9 = vld [vmem:[%s1017_s6 + $0x20] sm:$0xff]  ;;  %v42_v16 = vld [vmem:[%s1017_s6 + $0x70] sm:$0xff] }
   0x6   :  { %732 = vmatmul.mubr.msk.bf16.vlgmr.msra.gmra.mxu1 %vm154_vm1, %v774_v4  ;;  %236 = vperm.xlu1 %771, %v32_v9   ;;  %v28_v14 = vld [vmem:[%s1017_s6] sm:$0xff] }
   0x7   :  { %726 = vmatmul.mubr.msk.bf16.vlgmr.msra.gmra.mxu0 %vm83_vm2, %v776_v6  ;;  %251 = vperm.xlu0 %770, %v35_v10  }
   0xa   :  { %241 = vperm.xlu1 %771, %v33_v11  }
   0xb   :  { %226 = vperm.xlu0 %770, %v30_v12  }
   0xe   :  { %231 = vperm.xlu1 %771, %v31_v13  }
   0xf   :  { %216 = vperm.xlu0 %770, %v28_v14  }
  0x12   :  { %221 = vperm.xlu1 %771, %v29_v15  }
  0x13   :  { %12 = vsyncpa [#allocation3], 0  ;;  %v43_v17 = vld [vmem:[%s1017_s6 + $0x78] sm:$0xff]  ;;  %314 = vperm.xlu0 %770, %v42_v16   ;;  %v40_v18 = vld [vmem:[%s1017_s6 + $0x60] sm:$0xff]  ;;  %vm342_vm3 = vcmask 523264   ;;  %vm660_vm4 = vcmask 57344  }
  0x14   :  { %v41_v19 = vld [vmem:[%s1017_s6 + $0x68] sm:$0xff]  ;;  %v38_v20 = vld [vmem:[%s1017_s6 + $0x50] sm:$0xff]  ;;  %v39_v21 = vld [vmem:[%s1017_s6 + $0x58] sm:$0xff] }
  0x15   :  { %v36_v22 = vld [vmem:[%s1017_s6 + $0x40] sm:$0xff]  ;;  %v37_v23 = vld [vmem:[%s1017_s6 + $0x48] sm:$0xff]  ;;  %v46_v26 = vld [vmem:[%s1017_s6 + $0x90] sm:$0xff] }
  0x16   :  { %319 = vperm.xlu1 %771, %v43_v17   ;;  %v44_v24 = vld [vmem:[%s1017_s6 + $0x80] sm:$0xff]  ;;  %v45_v25 = vld [vmem:[%s1017_s6 + $0x88] sm:$0xff]  ;;  %v47_v27 = vld [vmem:[%s1017_s6 + $0x98] sm:$0xff] }
  0x17   :  { %304 = vperm.xlu0 %770, %v40_v18   ;;  %v52_v28 = vld [vmem:[%s1017_s6 + $0xc0] sm:$0xff]  ;;  %v53_v29 = vld [vmem:[%s1017_s6 + $0xc8] sm:$0xff]  ;;  %v54_v31 = vld [vmem:[%s1017_s6 + $0xd0] sm:$0xff] }
  0x18   :  { %v48_v30 = vld [vmem:[%s1017_s6 + $0xa0] sm:$0xff]  ;;  %v49_v32 = vld [vmem:[%s1017_s6 + $0xa8] sm:$0xff]  ;;  %v55_v33 = vld [vmem:[%s1017_s6 + $0xd8] sm:$0xff] }
  0x19   :  { %v50_v34 = vld [vmem:[%s1017_s6 + $0xb0] sm:$0xff]  ;;  %v56_v35 = vld [vmem:[%s1017_s6 + $0xe0] sm:$0xff]  ;;  %v51_v36 = vld [vmem:[%s1017_s6 + $0xb8] sm:$0xff] }
  0x1a   :  { %309 = vperm.xlu1 %771, %v41_v19   ;;  %v57_v37 = vld [vmem:[%s1017_s6 + $0xe8] sm:$0xff]  ;;  %v58_v38 = vld [vmem:[%s1017_s6 + $0xf0] sm:$0xff]  ;;  %v59_v39 = vld [vmem:[%s1017_s6 + $0xf8] sm:$0xff] }
  0x1b   :  { %294 = vperm.xlu0 %770, %v38_v20   ;;  %v60_v40 = vld [vmem:[%s1017_s6 + $0x100] sm:$0x1]  ;;  %v778_v14 = vld [vmem:[%s1015_s4 + $0x8] sm:$0xff]   ;;  %v779_v15 = vld [vmem:[%s1015_s4 + $0x10] sm:$0xff]  }
  0x1c   :  { %v777_v41 = vld [vmem:[%s1015_s4] sm:$0xff]   ;;  %v780_v16 = vld [vmem:[%s1015_s4 + $0x18] sm:$0xff]  }
  0x1d   :  { %743 = vmatprep.mubr.msk.bf16.mxu0 %vm342_vm3, %v777_v41  ;;  %v781_v17 = vld [vmem:[%s1016_s5] sm:$0xff]  }
  0x1e   :  { %299 = vperm.xlu1 %771, %v39_v21   ;;  %759 = vmatprep.mubr.msk.bf16.mxu1 %vm342_vm3, %v781_v17 }
  0x1f   :  { %284 = vperm.xlu0 %770, %v36_v22  }
  0x22   :  { %289 = vperm.xlu1 %771, %v37_v23  }
  0x23   :  { %442 = vperm.xlu0 %770, %v44_v24  }
  0x26   :  { %447 = vperm.xlu1 %771, %v45_v25  }
  0x27   :  { %452 = vperm.xlu0 %770, %v46_v26  }
  0x2a   :  { %457 = vperm.xlu1 %771, %v47_v27  }
  0x2b   :  { %587 = vperm.xlu0 %770, %v52_v28  }
  0x2e   :  { %592 = vperm.xlu1 %771, %v53_v29  }
  0x2f   :  { %462 = vperm.xlu0 %770, %v48_v30  }
  0x32   :  { %597 = vperm.xlu1 %771, %v54_v31  }
  0x33   :  { %467 = vperm.xlu0 %770, %v49_v32  }
  0x36   :  { %602 = vperm.xlu1 %771, %v55_v33  }
  0x37   :  { %472 = vperm.xlu0 %770, %v50_v34  }
  0x3a   :  { %607 = vperm.xlu1 %771, %v56_v35  }
  0x3b   :  { %477 = vperm.xlu0 %770, %v51_v36  }
  0x3e   :  { %612 = vperm.xlu1 %771, %v57_v37  }
  0x3f   :  { %617 = vperm.xlu0 %770, %v58_v38  }
  0x42   :  { %622 = vperm.xlu1 %771, %v59_v39  }
  0x43   :  { %656 = vperm.xlu0 %770, %v60_v40  }
  0x7d   :  { %v247_v43 = vpop.permute.xlu0 %246 }
  0x81   :  { %v237_v42 = vpop.permute.xlu1 %236 }
  0x82   :  { %v252_v45 = vpop.permute.xlu0 %251 }
  0x85   :  { %v242_v44 = vpop.permute.xlu1 %241 }
  0x86   :  { %v227_v53 = vpop.permute.xlu0 %226 }
  0x89   :  { %v232_v49 = vpop.permute.xlu1 %231 }
  0x8a   :  { %v217_v7 = vpop.permute.xlu0 %216 }
  0x8d   :  { %v222_v3 = vpop.permute.xlu1 %221 }
  0x8e   :  { %v315_v20 = vpop.permute.xlu0 %314 }
  0x91   :  { %v320_v18 = vpop.permute.xlu1 %319 }
  0x92   :  { %v305_v25 = vpop.permute.xlu0 %304 }
  0x95   :  { %v310_v23 = vpop.permute.xlu1 %309 }
  0x96   :  { %v295_v33 = vpop.permute.xlu0 %294 }
  0x99   :  { %v300_v29 = vpop.permute.xlu1 %299 }
  0xc6   :  { %v733_v46 = vpop.f32.mrf.mxu1 }
  0xc7   :  { %v727_v47 = vpop.f32.mrf.mxu0  ;;  %v260_v50 = vadd.f32 %v733_v46, %v247_v43  ;;  %v290_v43 = vpop.permute.xlu1 %289 }
  0xc8   :  { %v199_v48 = vpop.f32.mrf.mxu1  ;;  %v256_v63 = vadd.f32 %v727_v47, %v227_v53  ;;  %v285_v47 = vpop.permute.xlu0 %284 }
  0xc9   :  { %v124_v51 = vpop.f32.mrf.mxu0  ;;  %v258_v54 = vadd.f32 %v237_v42, %v199_v48  ;;  %v268_v58 = vmax.f32 %v260_v50, 0.0 }
  0xca   :  { %v734_v52 = vpop.f32.mrf.mxu1  ;;  %v264_v8 = vmax.f32 %v256_v63, 0.0  ;;  %v254_v9 = vadd.f32 %v217_v7, %v124_v51 }
  0xcb   :  { %v261_v55 = vadd.f32 %v734_v52, %v252_v45  ;;  %v728_v56 = vpop.f32.mrf.mxu0  ;;  %v266_v0 = vmax.f32 %v258_v54, 0.0  ;;  %v782_v54 = vld [vmem:[%s1016_s5 + $0x8] sm:$0xff]  }
  0xcc   :  { %v202_v57 = vpop.f32.mrf.mxu1  ;;  %v257_v60 = vadd.f32 %v728_v56, %v232_v49  ;;  %v262_v12 = vmax.f32 %v254_v9, 0.0  ;;  %v784_v56 = vld [vmem:[%s1016_s5 + $0x18] sm:$0xff]  }
  0xcd   :  { %v269_v59 = vmax.f32 %v261_v55, 0.0  ;;  %v259_v61 = vadd.f32 %v242_v44, %v202_v57  ;;  %v127_v62 = vpop.f32.mrf.mxu0  ;;  %v783_v55 = vld [vmem:[%s1016_s5 + $0x10] sm:$0xff]   ;;  %v443_v57 = vpop.permute.xlu0 %442  ;;  %s808_s5 = smov [#allocation2]  }
  0xce   :  { %v265_v4 = vmax.f32 %v257_v60, 0.0  ;;  %v255_v6 = vadd.f32 %v222_v3, %v127_v62  ;;  %s668_s10 = sshll.u32 %s808_s5, 4  ;;  %s669_s10 = int_to_ptr.vmem [resolvable:$true] %s668_s10 }
  0xcf   :  { %v281_v1 = vpack.c.bf16 %v269_v59, %v268_v58  ;;  %v267_v2 = vmax.f32 %v259_v61, 0.0  ;;  %v448_v58 = vpop.permute.xlu1 %447  ;;  %s785_s11 = scalar_lea.vmem %s669_s10, 16  ;;  %s789_s12 = scalar_lea.vmem %s669_s10, 32 }
  0xd0   :  { %v279_v10 = vpack.c.bf16 %v265_v4, %v264_v8  ;;  %v263_v11 = vmax.f32 %v255_v6, 0.0  ;;  %p786_p0 = scmp.ne.s32.totalorder %s669_s10, %s785_s11  ;;  %p790_p1 = scmp.lt.s32.totalorder %s669_s10, %s669_s10 }
  0xd1   :  { %v280_v5 = vpack.c.bf16 %v267_v2, %v266_v0  ;;  %735 = vmatprep.subr.bf16.mxu0 %v281_v1  ;;  %v453_v59 = vpop.permute.xlu0 %452  ;;  %p791_p2 = scmp.lt.s32.totalorder %s789_s12, %s785_s11 }
  0xd2   :  { %736 = vmatpush3.bf16.msra.mxu0 %v281_v1  ;;  %v278_v13 = vpack.c.bf16 %v263_v11, %v262_v12 }
  0xd3   :  { %737 = vmatprep.subr.bf16.mxu0 %v280_v5  ;;  %v458_v60 = vpop.permute.xlu1 %457  ;;  %p792_p3 = por %p791_p2, %p790_p1 }
  0xd5   :  { %v588_v61 = vpop.permute.xlu0 %587  ;;  %p793_p4 = pnand %p792_p3, %p786_p0 }
  0xd6   :  { %738 = vmatpush3.bf16.msra.mxu0 %v280_v5 }
  0xd7   :  { %739 = vmatprep.subr.bf16.mxu0 %v279_v10  ;;  %v593_v62 = vpop.permute.xlu1 %592 }
  0xd9   :  { %v463_v63 = vpop.permute.xlu0 %462 }
  0xda   :  { %740 = vmatpush3.bf16.msra.mxu0 %v279_v10 }
  0xdb   :  { %741 = vmatprep.subr.bf16.mxu0 %v278_v13  ;;  %v598_v0 = vpop.permute.xlu1 %597 }
  0xdd   :  { %v468_v1 = vpop.permute.xlu0 %467 }
  0xde   :  { %742 = vmatpush3.bf16.msra.mxu0 %v278_v13 }
  0xdf   :  { %v603_v3 = vpop.permute.xlu1 %602 }
  0xe1   :  { %744 = vmatmul.mubr.msk.bf16.vlgmr.msra.gmra.mxu0 %vm342_vm3, %v778_v14  ;;  %v473_v10 = vpop.permute.xlu0 %472 }
  0xe2   :  { %747 = vmatprep.mubr.msk.bf16.mxu0 %vm342_vm3, %v779_v15 }
  0xe3   :  { %v608_v14 = vpop.permute.xlu1 %607 }
  0xe9   :  { %748 = vmatmul.mubr.msk.bf16.gmra.mxu0 %vm342_vm3, %v780_v16 }
 0x1a1   :  { %v745_v19 = vpop.f32.mrf.mxu0 }
 0x1a2   :  { %v398_v39 = vadd.f32 %v745_v19, %v295_v33 }
 0x1a3   :  { %v389_v21 = vpop.f32.mrf.mxu0 }
 0x1a4   :  { %v422_v48 = vmax.f32 %v398_v39, 0.0  ;;  %v390_v49 = vadd.f32 %v389_v21, %v285_v47 }
 0x1a5   :  { %v746_v22 = vpop.f32.mrf.mxu0 }
 0x1a6   :  { %v401_v35 = vadd.f32 %v746_v22, %v300_v29  ;;  %v420_v52 = vmax.f32 %v390_v49, 0.0 }
 0x1a7   :  { %v392_v24 = vpop.f32.mrf.mxu0 }
 0x1a8   :  { %v423_v44 = vmax.f32 %v401_v35, 0.0  ;;  %v393_v45 = vadd.f32 %v392_v24, %v290_v43  ;;  %v478_v24 = vpop.permute.xlu0 %477 }
 0x1a9   :  { %v749_v26 = vpop.f32.mrf.mxu0 }
 0x1aa   :  { %v414_v28 = vadd.f32 %v749_v26, %v315_v20  ;;  %v437_v50 = vpack.c.bf16 %v423_v44, %v422_v48  ;;  %v421_v51 = vmax.f32 %v393_v45, 0.0 }
 0x1ab   :  { %v405_v27 = vpop.f32.mrf.mxu0 }
 0x1ac   :  { %v406_v31 = vadd.f32 %v405_v27, %v305_v25  ;;  %v426_v36 = vmax.f32 %v414_v28, 0.0  ;;  %v436_v53 = vpack.c.bf16 %v421_v51, %v420_v52 }
 0x1ad   :  { %v750_v30 = vpop.f32.mrf.mxu0 }
 0x1ae   :  { %v417_v32 = vadd.f32 %v750_v30, %v320_v18  ;;  %v424_v40 = vmax.f32 %v406_v31, 0.0  ;;  %v613_v31 = vpop.permute.xlu1 %612 }
 0x1af   :  { %v408_v34 = vpop.f32.mrf.mxu0 }
 0x1b0   :  { %v427_v37 = vmax.f32 %v417_v32, 0.0  ;;  %v409_v38 = vadd.f32 %v408_v34, %v310_v23 }
 0x1b2   :  { %v439_v41 = vpack.c.bf16 %v427_v37, %v426_v36  ;;  %v425_v42 = vmax.f32 %v409_v38, 0.0  ;;  %v623_v47 = vpop.permute.xlu1 %622 }
 0x1b4   :  { %v438_v46 = vpack.c.bf16 %v425_v42, %v424_v40  ;;  %751 = vmatprep.subr.bf16.mxu1 %v439_v41  ;;  %v618_v42 = vpop.permute.xlu0 %617 }
 0x1b5   :  { %752 = vmatpush3.bf16.msra.mxu1 %v439_v41 }
 0x1b6   :  { %753 = vmatprep.subr.bf16.mxu1 %v438_v46 }
 0x1b9   :  { %754 = vmatpush3.bf16.msra.mxu1 %v438_v46 }
 0x1ba   :  { %755 = vmatprep.subr.bf16.mxu1 %v437_v50 }
 0x1bd   :  { %756 = vmatpush3.bf16.msra.mxu1 %v437_v50 }
 0x1be   :  { %757 = vmatprep.subr.bf16.mxu1 %v436_v53 }
 0x1c1   :  { %758 = vmatpush3.bf16.msra.mxu1 %v436_v53 }
 0x1c4   :  { %760 = vmatmul.mubr.msk.bf16.vlgmr.msra.gmra.mxu1 %vm342_vm3, %v782_v54 }
 0x1c5   :  { %763 = vmatprep.mubr.msk.bf16.mxu1 %vm342_vm3, %v783_v55 }
 0x1cc   :  { %764 = vmatmul.mubr.msk.bf16.gmra.mxu1 %vm342_vm3, %v784_v56 }
 0x284   :  { %v761_v2 = vpop.f32.mrf.mxu1 }
 0x285   :  { %v555_v5 = vadd.f32 %v761_v2, %v453_v59 }
 0x286   :  { %v546_v4 = vpop.f32.mrf.mxu1 }
 0x287   :  { %v547_v6 = vadd.f32 %v546_v4, %v443_v57  ;;  %v579_v12 = vmax.f32 %v555_v5, 0.0 }
 0x288   :  { %v762_v7 = vpop.f32.mrf.mxu1 }
 0x289   :  { %v577_v8 = vmax.f32 %v547_v6, 0.0  ;;  %v558_v9 = vadd.f32 %v762_v7, %v458_v60  ;;  %v627_v20 = vmul.f32 %v598_v0, %v579_v12 }
 0x28a   :  { %v549_v11 = vpop.f32.mrf.mxu1 }
 0x28b   :  { %v550_v13 = vadd.f32 %v549_v11, %v448_v58  ;;  %v625_v15 = vmul.f32 %v588_v61, %v577_v8  ;;  %v580_v17 = vmax.f32 %v558_v9, 0.0  ;;  %v636_v34 = vsel %vm154_vm1, %v627_v20, 0.0 }
 0x28c   :  { %v765_v16 = vpop.f32.mrf.mxu1 }
 0x28d   :  { %v578_v18 = vmax.f32 %v550_v13, 0.0  ;;  %v571_v22 = vadd.f32 %v765_v16, %v473_v10  ;;  %v633_v25 = vsel %vm154_vm1, %v625_v15, 0.0  ;;  %v628_v27 = vmul.f32 %v603_v3, %v580_v17 }
 0x28e   :  { %v562_v19 = vpop.f32.mrf.mxu1 }
 0x28f   :  { %v626_v21 = vmul.f32 %v593_v62, %v578_v18  ;;  %v563_v23 = vadd.f32 %v562_v19, %v463_v63  ;;  %v583_v35 = vmax.f32 %v571_v22, 0.0  ;;  %v638_v39 = vsel %vm154_vm1, %v628_v27, 0.0  ;;  %v657_v62 = vpop.permute.xlu0 %656 }
 0x290   :  { %v766_v26 = vpop.f32.mrf.mxu1 }
 0x291   :  { %v634_v28 = vsel %vm154_vm1, %v626_v21, 0.0  ;;  %v581_v29 = vmax.f32 %v563_v23, 0.0  ;;  %v574_v30 = vadd.f32 %v766_v26, %v478_v24  ;;  %v631_v44 = vmul.f32 %v618_v42, %v583_v35 }
 0x292   :  { %v635_v32 = vadd.f32 %v634_v28, %v633_v25  ;;  %v565_v33 = vpop.f32.mrf.mxu1 }
 0x293   :  { %v629_v36 = vmul.f32 %v608_v14, %v581_v29  ;;  %v566_v37 = vadd.f32 %v565_v33, %v468_v1  ;;  %v584_v40 = vmax.f32 %v574_v30, 0.0  ;;  %v644_v52 = vsel %vm154_vm1, %v631_v44, 0.0 }
 0x294   :  { %v637_v38 = vadd.f32 %v636_v34, %v635_v32 }
 0x295   :  { %v582_v41 = vmax.f32 %v566_v37, 0.0  ;;  %v640_v45 = vsel %vm154_vm1, %v629_v36, 0.0  ;;  %v632_v49 = vmul.f32 %v623_v47, %v584_v40 }
 0x296   :  { %v639_v43 = vadd.f32 %v638_v39, %v637_v38 }
 0x297   :  { %v630_v46 = vmul.f32 %v613_v31, %v582_v41  ;;  %v646_v54 = vsel %vm154_vm1, %v632_v49, 0.0 }
 0x298   :  { %v641_v48 = vadd.f32 %v640_v45, %v639_v43 }
 0x299   :  { %v642_v50 = vsel %vm154_vm1, %v630_v46, 0.0 }
 0x29a   :  { %v643_v51 = vadd.f32 %v642_v50, %v641_v48 }
 0x29c   :  { %v645_v53 = vadd.f32 %v644_v52, %v643_v51 }
 0x29e   :  { %v647_v55 = vadd.f32 %v646_v54, %v645_v53 }
 0x2a0   :  { %v648_v56 = vrot.slane %v647_v55, 4 }
 0x2a2   :  { %v649_v57 = vadd.f32 %v648_v56, %v647_v55 }
 0x2a4   :  { %v650_v58 = vrot.slane %v649_v57, 2 }
 0x2a6   :  { %v651_v59 = vadd.f32 %v650_v58, %v649_v57 }
 0x2a8   :  { %v652_v60 = vrot.slane %v651_v59, 1 }
 0x2aa   :  { %v653_v61 = vadd.f32 %v652_v60, %v651_v59 }
 0x2ac   :  { %v659_v63 = vadd.f32 %v657_v62, %v653_v61 }
 0x2ae   :  { %661 = vst.msk [vmem:[#allocation2] sm:$0x1] %vm660_vm4, %v659_v63 }
 0x2af   :  { %796 = shalt.err (!%p793_p4)
}
 0x2b0   :  { %671 = dma.vmem_to_hbm [thread:$0]  %s669_s10, 16, %s1018_s7, [#allocation3]  }
 0x2b1   :  { %805 = dma.done.wait [#allocation3], 16  }
 0x2b2   :  { %806 = vsyncadd [#allocation3], 4294967280 }
 0x2b3   :  { %675 = vsyncpa [#allocation3], 1 }

</bundles_post_ra>
